<compile_context>
chip_gen: v6e
topology: v6e:2x2x1
jax: 0.10.0
libtpu: 0.0.40
codegen_flags: <defaults>
</compile_context>

<pallas_src>
import functools

import jax
import jax.numpy as jnp
from jax.experimental import pallas as pl
from jax.experimental.pallas import tpu as pltpu


def _round_up(x: int, m: int) -> int:
    return (x + m - 1) // m * m


def _vmem_estimate(bb, n_pad, e, a, d, enc_bytes):
    """Rough per-step VMEM footprint (bytes) for a batch block of size bb."""
    enc_blk = bb * n_pad * e * enc_bytes                    # encoder tile
    io_blk = bb * d * 4 + bb * e * 4 + bb * n_pad * 4       # dec in + ctx/alpha out
    weights = e * a * enc_bytes + d * a * 4 + 2 * a * 4     # We, Wd, bias, wf
    interm = 2 * bb * n_pad * a * 4 + 3 * bb * n_pad * 4    # att1/h + score/exp/alpha (f32)
    # BlockSpec pipelining double-buffers every in/out block (weights too).
    return 2 * (enc_blk + io_blk + weights) + interm


def _pick_block_b(batch, n_pad, e, a, d, enc_bytes, budget):
    """Largest sublane-aligned batch block that fits the VMEM budget, preferring
    >= 4 grid steps (>= 2 per v7x TensorCore), then >= 2, then whatever fits."""
    cands = [bb for bb in range(batch, 0, -1)
             if batch % bb == 0 and (bb % 8 == 0 or bb == batch)]
    fitting = [bb for bb in cands
               if _vmem_estimate(bb, n_pad, e, a, d, enc_bytes) <= budget]
    if not fitting:
        # TODO(synk): when even the smallest legal batch block exceeds the VMEM
        # budget (huge N*E), tile the pixel axis inside the kernel with a
        # two-pass / online softmax instead of falling back like this.
        return cands[-1]
    for target_steps in (4, 2, 1):
        for bb in fitting:                       # descending: largest block first
            if batch // bb >= target_steps:
                return bb
    return fitting[-1]


def _attention_kernel(enc_ref, dec_ref, we_ref, wd_ref, bias_ref, wf_ref,
                      ctx_ref, alpha_ref, *, n_pixels):
    bb, n_pad, e_dim = enc_ref.shape
    a_dim = we_ref.shape[1]

    # ---- encoder_att: ONE fused MXU matmul over all bb*n_pad pixel rows -------
    # (bias folded into the decoder-side bias below; f32 accumulation)
    att1 = jnp.dot(enc_ref[...].reshape(bb * n_pad, e_dim), we_ref[...],
                   preferred_element_type=jnp.float32).reshape(bb, n_pad, a_dim)

    # ---- decoder_att (tiny matmul) + folded (bd + be) bias ---------------------
    att2 = jnp.dot(dec_ref[...], wd_ref[...],
                   preferred_element_type=jnp.float32) + bias_ref[...]     # (bb, A)

    h = jnp.maximum(att1 + att2[:, None, :], 0.0)            # (bb, n_pad, A) f32

    # ---- full_att as VPU multiply + XLU lane reduce (no 1-column MXU matmul).
    # full_att's bias is a constant shift -> cancels in the softmax.
    scores = jnp.sum(h * wf_ref[...].reshape(1, 1, a_dim),
                     axis=-1, keepdims=True)                 # (bb, n_pad, 1) f32

    # ---- masked softmax over the pixel (sublane) axis --------------------------
    if n_pixels < n_pad:  # static: only if the pixel axis was sublane-padded
        pix = jax.lax.broadcasted_iota(jnp.int32, (bb, n_pad, 1), 1)
        scores = jnp.where(pix < n_pixels, scores, -1e30)    # keep score math f32
    m = jnp.max(scores, axis=1, keepdims=True)               # (bb, 1, 1)
    e = jnp.exp(scores - m)                                  # padded pixels -> 0
    denom = jnp.sum(e, axis=1, keepdims=True)                # (bb, 1, 1)
    alpha = e * pl.reciprocal(denom)                         # exact: rows sum to 1

    # ---- context: re-read enc from the ref (short live range), VPU mul + sublane
    # reduce; padded pixels are zero rows so they contribute nothing.
    ctx = jnp.sum(enc_ref[...].astype(jnp.float32) * alpha, axis=1)        # (bb, E)

    ctx_ref[...] = ctx.astype(ctx_ref.dtype)
    alpha_ref[...] = alpha.astype(alpha_ref.dtype)           # (bb, n_pad, 1)


def attention_pallas(encoder_out, decoder_hidden, params, *, block_b=None,
                     matmul_dtype=jnp.bfloat16, vmem_budget_bytes=24 << 20):
    """encoder_out: (B, N, E); decoder_hidden: (B, D).

    params: we (E, A), be (A,), wd (D, A), bd (A,), wf (A, 1), bf (1,)
    (linear weights stored pre-transposed as (in_dim, out_dim)).
    Returns (context (B, E), alpha (B, N)) — same semantics as the torch module.
    matmul_dtype: dtype of the MXU operands (enc, We). Default bf16 (halves the
    dominant encoder HBM/VMEM bytes); softmax/context math is always f32.
    """
    B, N, E = encoder_out.shape
    D = decoder_hidden.shape[1]
    A = params["we"].shape[1]

    enc_dtype = jnp.dtype(matmul_dtype) if matmul_dtype is not None else jnp.dtype(encoder_out.dtype)
    enc_bytes = enc_dtype.itemsize
    sub = 8 if enc_bytes >= 4 else (16 if enc_bytes == 2 else 32)
    n_pad = _round_up(N, sub)          # sublane granule only — NOT 128

    enc_p = encoder_out
    if n_pad != N:
        enc_p = jnp.pad(enc_p, ((0, 0), (0, n_pad - N), (0, 0)))
    enc_p = enc_p.astype(enc_dtype)    # no-op if already matmul dtype
    we_p = params["we"].astype(enc_dtype)

    dec = decoder_hidden.astype(jnp.float32)
    wd = params["wd"].astype(jnp.float32)
    bias = (params["bd"] + params["be"]).reshape(1, A).astype(jnp.float32)  # be folded
    wf_row = params["wf"].reshape(1, A).astype(jnp.float32)
    # params["bf"] intentionally unused: constant shift cancels in the softmax.

    if block_b is None:
        block_b = _pick_block_b(B, n_pad, E, A, D, enc_bytes, vmem_budget_bytes)
    assert B % block_b == 0, "batch must be divisible by block_b"
    assert block_b % 8 == 0 or block_b == B, "block_b must be sublane-aligned or the full batch"

    est = _vmem_estimate(block_b, n_pad, E, A, D, enc_bytes)
    vmem_limit = int(min(56 << 20, max(32 << 20, est + (est >> 2))))

    kernel = functools.partial(_attention_kernel, n_pixels=N)

    ctx, alpha_p = pl.pallas_call(
        kernel,
        out_shape=(
            jax.ShapeDtypeStruct((B, E), jnp.float32),
            jax.ShapeDtypeStruct((B, n_pad, 1), jnp.float32),
        ),
        grid_spec=pltpu.PrefetchScalarGridSpec(
            num_scalar_prefetch=0,
            grid=(B // block_b,),
            in_specs=[
                pl.BlockSpec((block_b, n_pad, E), lambda b: (b, 0, 0)),  # enc
                pl.BlockSpec((block_b, D), lambda b: (b, 0)),            # dec
                pl.BlockSpec((E, A), lambda b: (0, 0)),                  # We
                pl.BlockSpec((D, A), lambda b: (0, 0)),                  # Wd
                pl.BlockSpec((1, A), lambda b: (0, 0)),                  # bd + be
                pl.BlockSpec((1, A), lambda b: (0, 0)),                  # wf row
            ],
            out_specs=[
                pl.BlockSpec((block_b, E), lambda b: (b, 0)),            # context
                pl.BlockSpec((block_b, n_pad, 1), lambda b: (b, 0, 0)),  # alpha
            ],
        ),
        compiler_params=pltpu.CompilerParams(
            dimension_semantics=("parallel",),
            vmem_limit_bytes=vmem_limit),
    )(enc_p, dec, we_p, wd, bias, wf_row)

    return ctx, alpha_p[:, :N, 0]


def attention_reference(encoder_out, decoder_hidden, params):
    """Pure-JAX reference mirroring the PyTorch forward."""
    att1 = encoder_out @ params["we"] + params["be"]                       # (B, N, A)
    att2 = (decoder_hidden @ params["wd"] + params["bd"])[:, None, :]      # (B, 1, A)
    att = (jnp.maximum(att1 + att2, 0.0) @ params["wf"])[..., 0] + params["bf"]  # (B, N)
    alpha = jax.nn.softmax(att, axis=1)                                    # (B, N)
    context = jnp.sum(encoder_out * alpha[..., None], axis=1)              # (B, E)
    return context, alpha


def init_params(key, encoder_dim, decoder_dim, attention_dim):
    k1, k2, k3, k4, k5, k6 = jax.random.split(key, 6)
    scale = 0.1
    return {
        # stored pre-transposed: (in_dim, out_dim)
        "we": scale * jax.random.normal(k1, (encoder_dim, attention_dim), jnp.float32),
        "be": scale * jax.random.normal(k2, (attention_dim,), jnp.float32),
        "wd": scale * jax.random.normal(k3, (decoder_dim, attention_dim), jnp.float32),
        "bd": scale * jax.random.normal(k4, (attention_dim,), jnp.float32),
        "wf": scale * jax.random.normal(k5, (attention_dim, 1), jnp.float32),
        "bf": scale * jax.random.normal(k6, (1,), jnp.float32),
    }


if __name__ == "__main__":
    B, N = 32, 16             # batch, num_pixels (e.g. 4x4 feature map flattened)
    encoder_dim, decoder_dim, attention_dim = 32, 32, 32

    key = jax.random.PRNGKey(0)
    kx, kh, kp = jax.random.split(key, 3)
    encoder_out = jax.random.normal(kx, (B, N, encoder_dim), jnp.float32)
    decoder_hidden = jax.random.normal(kh, (B, decoder_dim), jnp.float32)
    params = init_params(kp, encoder_dim, decoder_dim, attention_dim)

    ctx_ref, alpha_ref = attention_reference(encoder_out, decoder_hidden, params)

    # Default path: bf16 MXU operands, f32 softmax/context (block_b=8 -> 4 grid steps).
    context, alpha = attention_pallas(encoder_out, decoder_hidden, params)
    jax.block_until_ready((context, alpha))
    assert context.shape == (B, encoder_dim)
    assert alpha.shape == (B, N)
    assert jnp.allclose(context, ctx_ref, atol=5e-2, rtol=5e-2)
    assert jnp.allclose(alpha, alpha_ref, atol=2e-2, rtol=5e-2)
    # exact-reciprocal softmax: rows sum to 1
    assert jnp.allclose(jnp.sum(alpha, axis=1), jnp.ones((B,)), atol=1e-4)

    # Full-f32 MXU path: tighter tolerances.
    ctx32, alpha32 = attention_pallas(encoder_out, decoder_hidden, params,
                                      matmul_dtype=jnp.float32)
    jax.block_until_ready((ctx32, alpha32))
    assert jnp.allclose(ctx32, ctx_ref, atol=5e-3, rtol=5e-3)
    assert jnp.allclose(alpha32, alpha_ref, atol=2e-3, rtol=5e-3)

    # Ragged pixel count: exercises the sublane pad (12 -> 16) + in-kernel mask.
    N2 = 12
    enc2 = encoder_out[:, :N2, :]
    ctx2, alpha2 = attention_pallas(enc2, decoder_hidden, params)
    jax.block_until_ready((ctx2, alpha2))
    c2_ref, a2_ref = attention_reference(enc2, decoder_hidden, params)
    assert alpha2.shape == (B, N2)
    assert jnp.allclose(ctx2, c2_ref, atol=5e-2, rtol=5e-2)
    assert jnp.allclose(alpha2, a2_ref, atol=2e-2, rtol=5e-2)

    print("KERNEL_OK")
</pallas_src>

<mosaic_0001>
module attributes {stable_mosaic.version = 11 : i64} {
  func.func @_attention_kernel(%arg0: i32, %arg1: memref<8x16x32xbf16, #tpu.memory_space<vmem>>, %arg2: memref<8x32xf32, #tpu.memory_space<vmem>>, %arg3: memref<32x32xbf16, #tpu.memory_space<vmem>>, %arg4: memref<32x32xf32, #tpu.memory_space<vmem>>, %arg5: memref<1x32xf32, #tpu.memory_space<vmem>>, %arg6: memref<1x32xf32, #tpu.memory_space<vmem>>, %arg7: memref<8x32xf32, #tpu.memory_space<vmem>>, %arg8: memref<8x16x1xf32, #tpu.memory_space<vmem>>) attributes {dimension_semantics = [#tpu.dimension_semantics<parallel>], iteration_bounds = array<i64: 4>, scalar_prefetch = 0 : i64, scratch_operands = 0 : i64, tpu.core_type = #tpu.core_type<tc>, window_params = [{transform_indices = @transform_0, window_bounds = array<i64: 8, 16, 32>}, {transform_indices = @transform_1, window_bounds = array<i64: 8, 32>}, {pipeline_mode = #tpu.pipeline_mode<synchronous>, transform_indices = @transform_2, window_bounds = array<i64: 32, 32>}, {pipeline_mode = #tpu.pipeline_mode<synchronous>, transform_indices = @transform_3, window_bounds = array<i64: 32, 32>}, {pipeline_mode = #tpu.pipeline_mode<synchronous>, transform_indices = @transform_4, window_bounds = array<i64: 1, 32>}, {pipeline_mode = #tpu.pipeline_mode<synchronous>, transform_indices = @transform_5, window_bounds = array<i64: 1, 32>}, {transform_indices = @transform_6, window_bounds = array<i64: 8, 32>}, {transform_indices = @transform_7, window_bounds = array<i64: 8, 16, 1>}]} {
    %c0 = arith.constant 0 : index
    %c0_0 = arith.constant 0 : index
    %c0_1 = arith.constant 0 : index
    %0 = vector.load %arg1[%c0, %c0_0, %c0_1] : memref<8x16x32xbf16, #tpu.memory_space<vmem>>, vector<8x16x32xbf16>
    %1 = vector.shape_cast %0 : vector<8x16x32xbf16> to vector<128x32xbf16>
    %c0_2 = arith.constant 0 : index
    %c0_3 = arith.constant 0 : index
    %2 = vector.load %arg3[%c0_2, %c0_3] : memref<32x32xbf16, #tpu.memory_space<vmem>>, vector<32x32xbf16>
    %cst = arith.constant dense<0.000000e+00> : vector<128x32xf32>
    %3 = tpu.matmul %1, %2, %cst {dimension_numbers = #tpu.dot_dimension_numbers<[1], [0], [0], [1], [0, 0, 1, 1], [], []>} : vector<128x32xbf16>, vector<32x32xbf16>, vector<128x32xf32> -> vector<128x32xf32>
    %4 = vector.shape_cast %3 : vector<128x32xf32> to vector<8x16x32xf32>
    %c0_4 = arith.constant 0 : index
    %c0_5 = arith.constant 0 : index
    %5 = vector.load %arg2[%c0_4, %c0_5] : memref<8x32xf32, #tpu.memory_space<vmem>>, vector<8x32xf32>
    %c0_6 = arith.constant 0 : index
    %c0_7 = arith.constant 0 : index
    %6 = vector.load %arg4[%c0_6, %c0_7] : memref<32x32xf32, #tpu.memory_space<vmem>>, vector<32x32xf32>
    %cst_8 = arith.constant dense<0.000000e+00> : vector<8x32xf32>
    %7 = tpu.matmul %5, %6, %cst_8 {dimension_numbers = #tpu.dot_dimension_numbers<[1], [0], [0], [1], [0, 0, 1, 1], [], []>} : vector<8x32xf32>, vector<32x32xf32>, vector<8x32xf32> -> vector<8x32xf32>
    %c0_9 = arith.constant 0 : index
    %c0_10 = arith.constant 0 : index
    %8 = vector.load %arg5[%c0_9, %c0_10] : memref<1x32xf32, #tpu.memory_space<vmem>>, vector<1x32xf32>
    %9 = vector.broadcast %8 : vector<1x32xf32> to vector<8x32xf32>
    %10 = arith.addf %7, %9 : vector<8x32xf32>
    %11 = vector.shape_cast %10 : vector<8x32xf32> to vector<8x1x32xf32>
    %12 = vector.broadcast %11 : vector<8x1x32xf32> to vector<8x16x32xf32>
    %13 = arith.addf %4, %12 : vector<8x16x32xf32>
    %cst_11 = arith.constant 0.000000e+00 : f32
    %14 = vector.broadcast %cst_11 : f32 to vector<8x16x32xf32>
    %15 = arith.maximumf %13, %14 : vector<8x16x32xf32>
    %c0_12 = arith.constant 0 : index
    %c0_13 = arith.constant 0 : index
    %16 = vector.load %arg6[%c0_12, %c0_13] : memref<1x32xf32, #tpu.memory_space<vmem>>, vector<1x32xf32>
    %17 = vector.shape_cast %16 : vector<1x32xf32> to vector<1x1x32xf32>
    %18 = vector.broadcast %17 : vector<1x1x32xf32> to vector<8x16x32xf32>
    %19 = arith.mulf %15, %18 : vector<8x16x32xf32>
    %cst_14 = arith.constant dense<0.000000e+00> : vector<8x16xf32>
    %20 = vector.multi_reduction <add>, %19, %cst_14 [2] : vector<8x16x32xf32> to vector<8x16xf32>
    %21 = vector.shape_cast %20 : vector<8x16xf32> to vector<8x16x1xf32>
    %cst_15 = arith.constant dense<0xFF800000> : vector<8x1xf32>
    %22 = vector.multi_reduction <maximumf>, %21, %cst_15 [1] : vector<8x16x1xf32> to vector<8x1xf32>
    %23 = vector.shape_cast %22 : vector<8x1xf32> to vector<8x1x1xf32>
    %24 = vector.broadcast %23 : vector<8x1x1xf32> to vector<8x16x1xf32>
    %25 = arith.subf %21, %24 : vector<8x16x1xf32>
    %26 = math.exp %25 : vector<8x16x1xf32>
    %cst_16 = arith.constant dense<0.000000e+00> : vector<8x1xf32>
    %27 = vector.multi_reduction <add>, %26, %cst_16 [1] : vector<8x16x1xf32> to vector<8x1xf32>
    %28 = vector.shape_cast %27 : vector<8x1xf32> to vector<8x1x1xf32>
    %29 = tpu.reciprocal %28 : vector<8x1x1xf32> -> vector<8x1x1xf32>
    %30 = vector.broadcast %29 : vector<8x1x1xf32> to vector<8x16x1xf32>
    %31 = arith.mulf %26, %30 : vector<8x16x1xf32>
    %c0_17 = arith.constant 0 : index
    %c0_18 = arith.constant 0 : index
    %c0_19 = arith.constant 0 : index
    %32 = vector.load %arg1[%c0_17, %c0_18, %c0_19] : memref<8x16x32xbf16, #tpu.memory_space<vmem>>, vector<8x16x32xbf16>
    %33 = arith.extf %32 : vector<8x16x32xbf16> to vector<8x16x32xf32>
    %34 = vector.broadcast %31 : vector<8x16x1xf32> to vector<8x16x32xf32>
    %35 = arith.mulf %33, %34 : vector<8x16x32xf32>
    %cst_20 = arith.constant dense<0.000000e+00> : vector<8x32xf32>
    %36 = vector.multi_reduction <add>, %35, %cst_20 [1] : vector<8x16x32xf32> to vector<8x32xf32>
    %c0_21 = arith.constant 0 : index
    %c0_22 = arith.constant 0 : index
    %37 = vector.load %arg7[%c0_21, %c0_22] : memref<8x32xf32, #tpu.memory_space<vmem>>, vector<8x32xf32>
    tpu.vector_store %arg7[%c0_21, %c0_22], %36 {strides = array<i32>} : memref<8x32xf32, #tpu.memory_space<vmem>>, vector<8x32xf32>,
    %c0_23 = arith.constant 0 : index
    %c0_24 = arith.constant 0 : index
    %c0_25 = arith.constant 0 : index
    %38 = vector.load %arg8[%c0_23, %c0_24, %c0_25] : memref<8x16x1xf32, #tpu.memory_space<vmem>>, vector<8x16x1xf32>
    tpu.vector_store %arg8[%c0_23, %c0_24, %c0_25], %31 {strides = array<i32>} : memref<8x16x1xf32, #tpu.memory_space<vmem>>, vector<8x16x1xf32>,
    return
  }
  func.func @transform_0(%arg0: i32) -> (i32, i32, i32) {
    %c0_i32 = arith.constant 0 : i32
    %c0_i32_0 = arith.constant 0 : i32
    %c0_i32_1 = arith.constant 0 : i32
    return %arg0, %c0_i32, %c0_i32_0 : i32, i32, i32
  }
  func.func @transform_1(%arg0: i32) -> (i32, i32) {
    %c0_i32 = arith.constant 0 : i32
    %c0_i32_0 = arith.constant 0 : i32
    return %arg0, %c0_i32 : i32, i32
  }
  func.func @transform_2(%arg0: i32) -> (i32, i32) {
    %c0_i32 = arith.constant 0 : i32
    %c0_i32_0 = arith.constant 0 : i32
    %c0_i32_1 = arith.constant 0 : i32
    return %c0_i32, %c0_i32_0 : i32, i32
  }
  func.func @transform_3(%arg0: i32) -> (i32, i32) {
    %c0_i32 = arith.constant 0 : i32
    %c0_i32_0 = arith.constant 0 : i32
    %c0_i32_1 = arith.constant 0 : i32
    return %c0_i32, %c0_i32_0 : i32, i32
  }
  func.func @transform_4(%arg0: i32) -> (i32, i32) {
    %c0_i32 = arith.constant 0 : i32
    %c0_i32_0 = arith.constant 0 : i32
    %c0_i32_1 = arith.constant 0 : i32
    return %c0_i32, %c0_i32_0 : i32, i32
  }
  func.func @transform_5(%arg0: i32) -> (i32, i32) {
    %c0_i32 = arith.constant 0 : i32
    %c0_i32_0 = arith.constant 0 : i32
    %c0_i32_1 = arith.constant 0 : i32
    return %c0_i32, %c0_i32_0 : i32, i32
  }
  func.func @transform_6(%arg0: i32) -> (i32, i32) {
    %c0_i32 = arith.constant 0 : i32
    %c0_i32_0 = arith.constant 0 : i32
    return %arg0, %c0_i32 : i32, i32
  }
  func.func @transform_7(%arg0: i32) -> (i32, i32, i32) {
    %c0_i32 = arith.constant 0 : i32
    %c0_i32_0 = arith.constant 0 : i32
    %c0_i32_1 = arith.constant 0 : i32
    return %arg0, %c0_i32, %c0_i32_0 : i32, i32, i32
  }
}

</mosaic_0001>

<bundles_post_ra>
// kernel: tpu_custom_call.1
= control target key start
LH: loop header
LB: loop body
LE: loop exit
PB: predicated region body
PF: predicated region fallthrough
CT: control target
= control target key end

     0   :  { %s2332_s0 = inlined_call_operand.hbm [shape: bf16[32,16,32], index: 0, kind: input, shape index: {}]   ;;  %s2333_s1 = inlined_call_operand.hbm [shape: f32[32,32], index: 1, kind: input, shape index: {}]   ;;  %s2334_s2 = inlined_call_operand.hbm [shape: bf16[32,32], index: 2, kind: input, shape index: {}]   ;;  %s2335_s3 = inlined_call_operand.hbm [shape: f32[32,32], index: 3, kind: input, shape index: {}]   ;;  %s2336_s4 = inlined_call_operand.vmem [shape: f32[1,32], index: 4, kind: input, shape index: {}]   ;;  %s2337_s5 = inlined_call_operand.vmem [shape: f32[1,32], index: 5, kind: input, shape index: {}]   ;;  %s2338_s6 = inlined_call_operand.hbm [shape: f32[32,32], index: 6, kind: output, shape index: {0}]   ;;  %s2339_s7 = inlined_call_operand.vmem [shape: f32[32,16,1], index: 7, kind: output, shape index: {1}]  }
   0x1   :  { %2347 = sst [smem:[#allocation18_spill]] %s2332_s0 }
   0x2   :  { %2348 = sst [smem:[#allocation19_spill]] %s2334_s2 }
   0x3   :  { %2349 = sst [smem:[#allocation20_spill]] %s2335_s3 }
   0x4   :  { %13 = vsyncpa [#allocation3], 0 }
   0x5   :  { %15 = vsyncpa [#allocation3 + $0x1], 0 }
   0x6   :  { %16 = vsyncpa [#allocation6], 0 }
   0x7   :  { %18 = vsyncpa [#allocation6 + $0x1], 0 }
   0x8   :  { %19 = vsyncpa [#allocation9], 0 }
   0x9   :  { %20 = vsyncpa [#allocation4], 0 }
   0xa   :  { %22 = vsyncpa [#allocation4 + $0x1], 0  ;;  %s1826_s24 = smov 0   ;;  %s1828_s25 = smov 0  }
   0xb   :  { %s1830_s26 = smov 0   ;;  %s1832_s27 = smov 0  }
   0xc LB: > { %2350 = sst [smem:[#allocation16_spill]] %s1768_s26  ;;  %s1847_s28 = sadd.s32 4294967295, %s1772_s27   ;;  %s1772_s27 = sphi %s1832_s27, %s2377_s27   ;;  %s1768_s26 = sphi %s1830_s26, %s2374_s26   ;;  %s1764_s25 = sphi %s1828_s25, %s2376_s25   ;;  %s1760_s24 = sphi %s1826_s24, %s2375_s24  }
   0xd   : > { %s1345_s29 = sadd.s32 4294967294, %s1772_s27   ;;  %p48_p0 = scmp.ne.s32.totalorder %s1764_s25, %s1760_s24 }
   0xe   : > { %p2342_p1 = scmp.eq.s32.totalorder %s1847_s28, 0  ;;  %p182_p2 = scmp.eq.s32.totalorder %s1847_s28, 3 }
   0xf   : > { %p188_p3 = scmp.eq.s32.totalorder %s1345_s29, 3  ;;  %p1346_p5 = scmp.ge.s32.totalorder %s1772_s27, 1 }
  0x10   : > { %p1856_p4 = por %p2342_p1, %p48_p0  ;;  %p221_p7 = scmp.lt.s32.totalorder %s1772_s27, 5 }
  0x11   : > { %p1861_p6 = por %p188_p3, %p48_p0  ;;  %s1774_s10 = smov [#allocation7]  }
  0x12   : > { %s2351_s30 = scalar_select %p1856_p4, 1, 0 }
  0x13   : > { %s2352_s8 = scalar_select %p1861_p6, 1, 0 }
  0x14   : > { %p1866_p8 = pnand %p1346_p5, %p221_p7  ;;  %s233_s11 = sshll.u32 %s1774_s10, 4  ;;  %s234_s11 = int_to_ptr.vmem [resolvable:$true] %s233_s11 }
  0x15   : > { %s1775_s13 = smov [#allocation8]   ;;  %s1599_s15 = scalar_lea.vmem %s234_s11, 256 }
  0x16   : > { %s2353_s9 = scalar_select %p1866_p8, 1, 0 }
  0x17   : > { %p1457_p9 = pneg %p1866_p8  ;;  %s246_s14 = sshll.u32 %s1775_s13, 4  ;;  %s247_s14 = int_to_ptr.vmem [resolvable:$true] %s246_s14 }
  0x18   : > { %p1600_p12 = scmp.ne.s32.totalorder %s234_s11, %s1599_s15  ;;  %p1607_p3 = scmp.lt.s32.totalorder %s234_s11, %s234_s11 }
  0x19   : > { %p1874_p10 = pnand %p1457_p9, %p2342_p1  ;;  %p1608_p5 = scmp.lt.s32.totalorder %s1599_s15, %s1599_s15 }
  0x1b   : > { %p1590_p11 = pneg %p1874_p10  ;;  %p1609_p7 = por %p1608_p5, %p1607_p3 }
  0x1d   : > { %p1602_p13 = pnand %p1600_p12, %p1590_p11 }
  0x1f   : > { %p1603_p0 = pneg %p1602_p13 }
  0x21   : > { %p1610_p9 = pnand %p1609_p7, %p1603_p0 }
  0x23   : > { %1613 = shalt.err (!%p1610_p9)
}
  0x24   : > { %s2340_s16 = smov 64   ;;  %s2341_s17 = smov 4  }
  0x25   : > { %s2355_s2 = sld [smem:[#allocation19_spill]]  ;;  %s1625_s20 = scalar_lea.vmem %s247_s14, 512 }
  0x26   : > { %p1626_p12 = scmp.ne.s32.totalorder %s247_s14, %s1625_s20  ;;  %p1633_p0 = scmp.lt.s32.totalorder %s247_s14, %s247_s14 }
  0x27   : > { %p1634_p5 = scmp.lt.s32.totalorder %s1625_s20, %s1625_s20 }
  0x28   : > { %p1628_p13 = pnand %p1626_p12, %p1590_p11 }
  0x29   : > { %p1635_p7 = por %p1634_p5, %p1633_p0 }
  0x2a   : > { %p1629_p3 = pneg %p1628_p13 }
  0x2b   : > { %1460 = dma.hbm_to_vmem [thread:$0]  (!%p1874_p10), %s2355_s2, 256, %s234_s11, [#allocation6], %s2340_s16, %s2340_s16, %s2341_s17  }
  0x2c   : > { %p1636_p9 = pnand %p1635_p7, %p1629_p3 }
  0x2e   : > { %1639 = shalt.err (!%p1636_p9)
}
  0x2f   : > { %s1778_s21 = smov 128   ;;  %s1779_s22 = smov 8  }
  0x30   : > { %s2356_s3 = sld [smem:[#allocation20_spill]]  ;;  %s1900_s10 = sadd.s32 1, %s1772_s27  }
  0x31   : > { %s32_s11 = ssub.s32 %s1772_s27, %s1900_s10  ;;  %s35_s13 = sadd.s32 1, %s1768_s26 }
  0x32   : > { %p33_p11 = scmp.eq.s32.totalorder %s32_s11, 0  ;;  %p42_p12 = scmp.ne.s32.totalorder %s1768_s26, %s1764_s25 }
  0x33   : > { %p43_p13 = scmp.eq.s32.totalorder %s1772_s27, 0  ;;  %p1477_p5 = scmp.lt.s32.totalorder %s1772_s27, 4 }
  0x34   : > { %s1909_s15 = scalar_select %p33_p11, %s1768_s26, %s35_s13  }
  0x35   : > { %p44_p3 = por %p43_p13, %p42_p12  ;;  %p1913_p0 = por %p182_p2, %p42_p12 }
  0x36   : > { %1463 = dma.hbm_to_vmem [thread:$0]  (!%p1874_p10), %s2356_s3, 512, %s247_s14, [#allocation9], %s1778_s21, %s1778_s21, %s1779_s22  }
  0x37   : > { %2357 = sst [smem:[#allocation17_spill]] %s1909_s15  ;;  %s1919_s12 = sand.u32 1, %s1768_s26  }
  0x38   : > { %s2358_s18 = scalar_select %p1913_p0, 1, 0 }
  0x39   : > { %s1350_s14 = sshll.u32 %s1919_s12, 6  ;;  %s1391_s19 = sshll.u32 %s1772_s27, 10 }
  0x3a   : > { %s2359_s0 = sld [smem:[#allocation18_spill]]  ;;  %s270_s23 = scalar_lea.vmem [#allocation2], %s1350_s14 }
  0x3b   : > { %s278_s29 = sshll.u32 %s270_s23, 4  ;;  %p1930_p2 = pnand %p1477_p5, %p44_p3  ;;  %s1928_s29 = int_to_ptr.vmem [resolvable:$true] %s278_s29 }
  0x3c   : > { %s267_s17 = scalar_lea.sflag [#allocation3], %s1919_s12 }
  0x3d   : > { %p1642_p7 = pneg %p1930_p2 }
  0x40   : > { %s1926_s22 = scalar_lea.hbm %s2359_s0, %s1391_s19  ;;  %s1645_s20 = scalar_lea.hbm %s2359_s0, 4096 }
  0x41   : > { %s1640_s2 = scalar_lea.hbm %s1926_s22, 1024  ;;  %p1646_p12 = scmp.lt.s32.totalorder %s1926_s22, %s2359_s0 }
  0x42   : > { %p1641_p10 = scmp.ne.s32.totalorder %s1926_s22, %s1640_s2  ;;  %p1647_p13 = scmp.lt.s32.totalorder %s1645_s20, %s1640_s2 }
  0x44   : > { %p1643_p9 = pnand %p1642_p7, %p1641_p10  ;;  %p1648_p3 = por %p1647_p13, %p1646_p12 }
  0x46   : > { %p1644_p11 = pneg %p1643_p9 }
  0x48   : > { %p1649_p5 = pnand %p1648_p3, %p1644_p11 }
  0x4a   : > { %1652 = shalt.err (!%p1649_p5)
}
  0x4b   : > { %s1653_s13 = scalar_lea.vmem %s1928_s29, 1024  ;;  %s1780_s14 = smov [#allocation2]  }
  0x4c   : > { %p1654_p1 = scmp.ne.s32.totalorder %s1928_s29, %s1653_s13  ;;  %s1658_s19 = sshll.u32 %s1780_s14, 4  ;;  %s1659_s19 = int_to_ptr.vmem [resolvable:$false] %s1658_s19 }
  0x4d   : > { %s1660_s16 = scalar_lea.vmem %s1659_s19, 2048  ;;  %p1661_p6 = scmp.lt.s32.totalorder %s1928_s29, %s1659_s19 }
  0x4e   : > { %p1656_p10 = pnand %p1654_p1, %p1642_p7  ;;  %p1662_p0 = scmp.lt.s32.totalorder %s1660_s16, %s1653_s13 }
  0x50   : > { %p1657_p9 = pneg %p1656_p10  ;;  %p1663_p4 = por %p1662_p0, %p1661_p6 }
  0x52   : > { %p1664_p12 = pnand %p1663_p4, %p1657_p9 }
  0x54   : > { %1667 = shalt.err (!%p1664_p12)
}
  0x55   : > { %s2361_s2 = smov 4   ;;  %s2362_s20 = smov 64  }
  0x56   : > { %1467 = dma.hbm_to_vmem [thread:$0]  (!%p1930_p2), %s1926_s22, 1024, %s1928_s29, %s267_s17, %s2362_s20, %s2362_s20, %s2361_s2  }
  0x57   : > { %s1355_s21 = sshll.u32 %s1772_s27, 7  ;;  %s2363_s14 = sshll.u32 %s1919_s12, 3 }
  0x58   : > { %s1970_s13 = scalar_lea.hbm %s2333_s1, %s1355_s21  ;;  %s292_s19 = scalar_lea.vmem [#allocation5], %s2363_s14 }
  0x59   : > { %s299_s0 = sshll.u32 %s292_s19, 4  ;;  %s2364_s3 = sand.u32 1, %s1772_s27   ;;  %s300_s0 = int_to_ptr.vmem [resolvable:$true] %s299_s0 }
  0x5a   : > { %s289_s15 = scalar_lea.sflag [#allocation6], %s2364_s3  ;;  %s1668_s26 = scalar_lea.hbm %s1970_s13, 128 }
  0x5b   : > { %p1669_p1 = scmp.ne.s32.totalorder %s1970_s13, %s1668_s26  ;;  %s1673_s29 = scalar_lea.hbm %s2333_s1, 512 }
  0x5c   : > { %p1674_p0 = scmp.lt.s32.totalorder %s1970_s13, %s2333_s1  ;;  %p1675_p11 = scmp.lt.s32.totalorder %s1673_s29, %s1668_s26 }
  0x5d   : > { %p1671_p4 = pnand %p1669_p1, %p1642_p7 }
  0x5e   : > { %p1676_p13 = por %p1675_p11, %p1674_p0 }
  0x5f   : > { %p1672_p6 = pneg %p1671_p4 }
  0x61   : > { %p1677_p3 = pnand %p1676_p13, %p1672_p6 }
  0x63   : > { %1680 = shalt.err (!%p1677_p3)
}
  0x64   : > { %s1681_s20 = scalar_lea.vmem %s300_s0, 128  ;;  %s1781_s3 = smov [#allocation5]  }
  0x65   : > { %p1682_p5 = scmp.ne.s32.totalorder %s300_s0, %s1681_s20  ;;  %s1686_s21 = sshll.u32 %s1781_s3, 4  ;;  %s1687_s21 = int_to_ptr.vmem [resolvable:$false] %s1686_s21 }
  0x66   : > { %s1688_s23 = scalar_lea.vmem %s1687_s21, 256  ;;  %p1689_p12 = scmp.lt.s32.totalorder %s300_s0, %s1687_s21 }
  0x67   : > { %p1684_p10 = pnand %p1682_p5, %p1642_p7  ;;  %p1690_p1 = scmp.lt.s32.totalorder %s1688_s23, %s1681_s20 }
  0x69   : > { %p1685_p9 = pneg %p1684_p10  ;;  %p1691_p4 = por %p1690_p1, %p1689_p12 }
  0x6b   : > { %p1692_p8 = pnand %p1691_p4, %p1685_p9 }
  0x6d   : > { %1695 = shalt.err (!%p1692_p8)
}
  0x6e   : > { %1470 = dma.hbm_to_vmem [thread:$0]  (!%p1930_p2), %s1970_s13, 128, %s300_s0, %s289_s15  }
  0x6f   : > { %p2365_p6 = scmp.ne.s32.totalorder %s2353_s9, 0 }
  0x70   : > { %s1997_s26 = sand.u32 (!%p2365_p6), 1, %s1764_s25   ;;  %p2366_p7 = scmp.ne.s32.totalorder (!%p2365_p6), %s2351_s30, 0 }
  0x71   : > { %308 = sbr.rel (%p2365_p6) target bundleno = 623 (0x26f), region = 44  ;;  %s1357_s16 = sshll.u32 (!%p2365_p6), %s1997_s26, 6 }
  0x72   : > { %s311_s14 = scalar_lea.sflag (!%p2365_p6), [#allocation3], %s1997_s26  ;;  %s2001_s19 = scalar_lea.vmem (!%p2365_p6), [#allocation2], %s1357_s16 }
  0x76   : > { %1739 = dma.done.wait (%p2366_p7), %s311_s14, 1024  }
  0x77   : > { %1741 = vsyncadd (%p2366_p7), %s311_s14, 4294966272  ;;  %s319_s0 = sand.u32 1, %s1847_s28   ;;  %s1358_s9 = sshll.u32 %s1997_s26, 3 }
  0x78   : > { %s320_s15 = scalar_lea.sflag [#allocation6], %s319_s0  ;;  %s2011_s11 = scalar_lea.vmem [#allocation5], %s1358_s9 }
  0x79   : > { %1743 = dma.done.wait (%p2366_p7), %s320_s15, 128  }
  0x7a   : > { %1745 = vsyncadd (%p2366_p7), %s320_s15, 4294967168  ;;  %p2367_p8 = scmp.eq.s32.totalorder %s1847_s28, 0 }
  0x7c   : > { %1747 = dma.done.wait (%p2367_p8), [#allocation6], 256   ;;  %p2368_p2 = pmov %p2367_p8 }
  0x7e   : > { %1749 = vsyncadd (%p2368_p2), [#allocation6], 4294967040  ;;  %p2369_p0 = pmov %p2368_p2 }
  0x80   : > { %1751 = dma.done.wait (%p2369_p0), [#allocation9], 512   ;;  %p2370_p11 = pmov %p2369_p0 }
  0x81   : > { %v1522_v0 = vld [vmem:[#allocation7 + $0x8] sm:$0xff]   ;;  %v1523_v1 = vld [vmem:[#allocation7] sm:$0xff]   ;;  %v2026_v2 = vld [vmem:[%s2001_s19] sm:$0xff]   ;;  %vm454_vm0 = vcmask 261120   ;;  %v1782_v7 = vmov 0.0   ;;  %vm1783_vm1 = vmmov 0   ;;  %v666_v18 = vlaneseq }
  0x82   : > { %1753 = vsyncadd (%p2370_p11), [#allocation9], 4294966784  ;;  %1408 = vmatprep.subr.bf16.mxu0 %v1522_v0  ;;  %1439 = vmatprep.subr.bf16.mxu1 %v1522_v0  ;;  %v2029_v3 = vld [vmem:[%s2001_s19 + $0x30] sm:$0xff]   ;;  %v2032_v4 = vld [vmem:[%s2001_s19 + $0x8] sm:$0xff]   ;;  %v1784_v16 = vmov 1966171168  }
  0x83   : > { %1409 = vmatpush3.bf16.msra.mxu0 %v1522_v0  ;;  %1441 = vmatpush3.bf16.msra.mxu1 %v1522_v0  ;;  %v2035_v5 = vld [vmem:[%s2001_s19 + $0x38] sm:$0xff]   ;;  %v2038_v6 = vld [vmem:[%s2001_s19 + $0x10] sm:$0xff]   ;;  %v578_v11 = vld [vmem:[#allocation8 + $0x8] sm:$0xff]  ;;  %v664_v17 = vunpack.c.l.s4 %v1784_v16  ;;  %v667_v24 = vshrl.u32 %v666_v18, 7  ;;  %s1362_s29 = sshll.u32 %s1847_s28, 3  ;;  %vm1166_vm2 = vcmask 7168  }
  0x84   : > { %1410 = vmatprep.subr.bf16.mxu0 %v1523_v1  ;;  %1440 = vmatprep.subr.bf16.mxu1 %v1523_v1  ;;  %v580_v8 = vld [vmem:[#allocation8 + $0x18] sm:$0xff]  ;;  %v579_v9 = vld [vmem:[#allocation8 + $0x10] sm:$0xff]  ;;  %v2054_v12 = vld [vmem:[%s2001_s19 + $0x20] sm:$0xff]   ;;  %p375_p13 = scmp.lt.s32.totalorder %s1362_s29, 31  ;;  %vm1150_vm3 = vcmask 1041409   ;;  %vm1152_vm4 = vcmask 1042434  }
  0x85   : > { %1412 = vmatprep.mubr.msk.bf16.mxu0 %vm454_vm0, %v2026_v2  ;;  %1424 = vmatprep.mubr.msk.bf16.mxu1 %vm454_vm0, %v2029_v3  ;;  %v2051_v10 = vld [vmem:[%s2001_s19 + $0x18] sm:$0xff]   ;;  %v577_v13 = vld [vmem:[#allocation8] sm:$0xff]  ;;  %v2063_v15 = vld [vmem:[%s2001_s19 + $0x28] sm:$0xff]   ;;  %v665_v23 = vunpack.c.0.s8 %v664_v17  ;;  %v2078_v38 = vsub.s32 0, %v667_v24  ;;  %vm1154_vm5 = vcmask 1043459   ;;  %vm1156_vm6 = vcmask 1044484  }
  0x86   : > { %v576_v14 = vld [vmem:[%s2011_s11] sm:$0xff]  ;;  %s2379_s29 = smov (!%p375_p13, %s1362_s29), 31  ;;  %vm1158_vm7 = vcmask 1045509   ;;  %vm1160_vm8 = vcmask 1046534   ;;  %s1387_s21 = sshll.u32 %s1847_s28, 7  ;;  %vm1162_vm9 = vcmask 1047559  }
  0x87   : > { %1411 = vmatpush3.bf16.msra.mxu0 %v1523_v1  ;;  %1442 = vmatpush3.bf16.msra.mxu1 %v1523_v1  ;;  %v1383_v29 = vld [vmem:[%s2336_s4] ss:$0 sm:$0xff]  ;;  %v668_v30 = vsub.s32 %v665_v23, %v667_v24  ;;  %s1392_s2 = sshll.u32 %s2379_s29, 4  ;;  %s364_s23 = scalar_lea.vmem [#allocation10], %s1358_s9 }
  0x88   : > { %1428 = vmatprep.subr.mxu1 %v1782_v7  ;;  %v2086_v54 = vld [vmem:[%s2337_s5] ss:$0 sm:$0xff]  ;;  %s2201_s3 = scalar_lea.vmem %s2339_s7, %s1392_s2  ;;  %s1203_s16 = sshll.u32 %s364_s23, 4  ;;  %s1204_s16 = int_to_ptr.vmem [resolvable:$true] %s1203_s16 }
  0x89   : > { %s2295_s0 = scalar_lea.hbm %s2338_s6, %s1387_s21  ;;  %s1184_s15 = scalar_lea.sflag [#allocation4], %s1997_s26 }
  0x8a   : > { %1413 = vmatmul.mubr.msk.bf16.vlgmr.msra.gmra.mxu0 %vm454_vm0, %v2032_v4  ;;  %1425 = vmatmul.mubr.msk.bf16.vlgmr.msra.gmra.mxu1 %vm454_vm0, %v2035_v5  ;;  %s1696_s11 = scalar_lea.vmem %s1204_s16, 128  ;;  %p2371_p5 = scmp.ne.s32.totalorder %s2358_s18, 0 }
  0x8b   : > { %1429 = vmatpush3.msra.mxu1 %v580_v8  ;;  %1416 = vmatprep.mubr.msk.bf16.mxu0 %vm454_vm0, %v2038_v6  ;;  %p1697_p3 = scmp.ne.s32.totalorder %s1204_s16, %s1696_s11  ;;  %s1785_s28 = smov [#allocation10]  }
  0x8c   : > { %1430 = vmatprep.subr.mxu1 %v1782_v7  ;;  %1436 = vmatprep.mubr.msk.f32.mxu1 %vm1783_vm1, %v1782_v7  ;;  %s1700_s9 = sshll.u32 %s1785_s28, 4  ;;  %s1701_s9 = int_to_ptr.vmem [resolvable:$false] %s1700_s9 }
  0x8d   : > { %1431 = vmatpush3.msra.mxu1 %v579_v9  ;;  %p1698_p10 = pnand %p1697_p3, %p2371_p5  ;;  %s1702_s30 = scalar_lea.vmem %s1701_s9, 256 }
  0x8e   : > { %1432 = vmatprep.subr.mxu1 %v1782_v7  ;;  %p1703_p12 = scmp.lt.s32.totalorder %s1204_s16, %s1701_s9  ;;  %p1704_p1 = scmp.lt.s32.totalorder %s1702_s30, %s1696_s11 }
  0x8f   : > { %1433 = vmatpush3.msra.mxu1 %v578_v11  ;;  %p1699_p9 = pneg %p1698_p10 }
  0x90   : > { %1434 = vmatprep.subr.mxu1 %v1782_v7  ;;  %p1705_p4 = por %p1704_p1, %p1703_p12 }
  0x91   : > { %1435 = vmatpush3.msra.mxu1 %v577_v13 }
  0x92   : > { %1417 = vmatmul.mubr.msk.bf16.gmra.mxu0 %vm454_vm0, %v2051_v10  ;;  %1437 = vmatmul.mubr.msk.f32.vlgmr.msra.gmra.mxu1 %vm454_vm0, %v576_v14  ;;  %p1706_p6 = pnand %p1705_p4, %p1699_p9 }
  0x93   : > { %1420 = vmatprep.mubr.msk.bf16.mxu0 %vm454_vm0, %v2054_v12 }
  0x9a   : > { %1421 = vmatmul.mubr.msk.bf16.gmra.mxu0 %vm454_vm0, %v2063_v15 }
 0x14a   : > { %v1414_v19 = vpop.f32.mrf.mxu0  ;;  %v2067_v20 = vpop.f32.mrf.mxu1 }
 0x14c   : > { %v513_v21 = vpop.f32.mrf.mxu0  ;;  %v2069_v22 = vpop.f32.mrf.mxu1 }
 0x14e   : > { %v1415_v25 = vpop.f32.mrf.mxu0  ;;  %v2071_v26 = vpop.f32.mrf.mxu1 }
 0x150   : > { %v516_v27 = vpop.f32.mrf.mxu0  ;;  %v2073_v28 = vpop.f32.mrf.mxu1 }
 0x152   : > { %v1418_v31 = vpop.f32.mrf.mxu0  ;;  %v657_v32 = vpop.f32.mrf.mxu1 }
 0x153   : > { %v658_v33 = vadd.f32 %v1383_v29, %v657_v32 }
 0x154   : > { %v529_v34 = vpop.f32.mrf.mxu0  ;;  %v1438_v35 = vpop.f32.mrf.mxu1 }
 0x155   : > { %v662_v36 = vcombine.high %v658_v33, %v658_v33  ;;  %v669_v37 = vrot.slane %v658_v33, %v668_v30 }
 0x156   : > { %v1419_v39 = vpop.f32.mrf.mxu0 }
 0x157   : > { %v676_v40 = vrot.slane %v662_v36, %v668_v30  ;;  %v677_v41 = vcombine.high %v669_v37, %v669_v37  ;;  %v685_v42 = vrot.slane %v669_v37, %v668_v30 }
 0x158   : > { %v532_v43 = vpop.f32.mrf.mxu0 }
 0x159   : > { %v707_v44 = vcombine.high %v685_v42, %v685_v42  ;;  %v699_v45 = vrot.slane %v677_v41, %v668_v30  ;;  %v692_v46 = vrot.slane %v676_v40, %v668_v30  ;;  %v714_v47 = vrot.slane %v685_v42, %v2078_v38 }
 0x15a   : > { %v1422_v49 = vpop.f32.mrf.mxu0  ;;  %v678_v50 = vcombine.high %v676_v40, %v676_v40 }
 0x15b   : > { %v722_v48 = vrot.slane %v707_v44, %v2078_v38  ;;  %v751_v51 = vadd.f32 %v714_v47, %v513_v21  ;;  %v718_v52 = vrot.slane %v699_v45, %v2078_v38  ;;  %v709_v53 = vcombine.high %v699_v45, %v699_v45 }
 0x15c   : > { %v752_v55 = vadd.f32 %v714_v47, %v516_v27  ;;  %v730_v57 = vrot.slane %v692_v46, %v2078_v38  ;;  %v545_v60 = vpop.f32.mrf.mxu0  ;;  %v706_v61 = vrot.slane %v678_v50, %v668_v30  ;;  %v708_v18 = vcombine.high %v692_v46, %v692_v46 }
 0x15d   : > { %v755_v56 = vadd.f32 %v722_v48, %v529_v34  ;;  %v767_v58 = vmax.f32 %v751_v51, 0.0  ;;  %v753_v59 = vadd.f32 %v1414_v19, %v718_v52  ;;  %v726_v63 = vrot.slane %v709_v53, %v2078_v38 }
 0x15e   : > { %v756_v0 = vadd.f32 %v722_v48, %v532_v43  ;;  %v768_v7 = vmax.f32 %v752_v55, 0.0  ;;  %v759_v9 = vadd.f32 %v730_v57, %v545_v60  ;;  %v754_v13 = vadd.f32 %v1415_v25, %v718_v52  ;;  %v1423_v27 = vpop.f32.mrf.mxu0 }
 0x15f   : > { %v790_v62 = vmul.f32 %v2086_v54, %v767_v58  ;;  %v769_v1 = vmax.f32 %v753_v59, 0.0  ;;  %v771_v8 = vmax.f32 %v755_v56, 0.0  ;;  %v734_v17 = vrot.slane %v706_v61, %v2078_v38 }
 0x160   : > { %v791_v16 = vmul.f32 %v2086_v54, %v768_v7  ;;  %v770_v19 = vmax.f32 %v754_v13, 0.0  ;;  %v757_v21 = vadd.f32 %v1418_v31, %v726_v63  ;;  %v758_v23 = vadd.f32 %v1419_v39, %v726_v63 }
 0x161   : > { %v806_v11 = vsel %vm454_vm0, %v790_v62, 0.0  ;;  %v792_v14 = vmul.f32 %v2086_v54, %v769_v1  ;;  %v772_v24 = vmax.f32 %v756_v0, 0.0  ;;  %v775_v30 = vmax.f32 %v759_v9, 0.0 }
 0x162   : > { %807 = vadd.xlane.f32.xlu0 %v806_v11  ;;  %v809_v32 = vsel %vm454_vm0, %v791_v16, 0.0  ;;  %v793_v25 = vmul.f32 %v2086_v54, %v770_v19  ;;  %v794_v33 = vmul.f32 %v2086_v54, %v771_v8  ;;  %v761_v34 = vadd.f32 %v1422_v49, %v734_v17  ;;  %v548_v49 = vpop.f32.mrf.mxu0 }
 0x163   : > { %v812_v29 = vsel %vm454_vm0, %v792_v14, 0.0  ;;  %v762_v35 = vadd.f32 %v1423_v27, %v734_v17  ;;  %v774_v36 = vmax.f32 %v758_v23, 0.0  ;;  %v795_v31 = vmul.f32 %v2086_v54, %v772_v24 }
 0x164   : > { %813 = vadd.xlane.f32.xlu1 %v812_v29  ;;  %v815_v37 = vsel %vm454_vm0, %v793_v25, 0.0  ;;  %v738_v39 = vrot.slane %v708_v18, %v2078_v38  ;;  %v710_v40 = vcombine.high %v706_v61, %v706_v61  ;;  %v818_v41 = vsel %vm454_vm0, %v794_v33, 0.0 }
 0x165   : > { %v798_v42 = vmul.f32 %v2086_v54, %v775_v30  ;;  %v773_v43 = vmax.f32 %v757_v21, 0.0  ;;  %v777_v44 = vmax.f32 %v761_v34, 0.0  ;;  %v778_v45 = vmax.f32 %v762_v35, 0.0 }
 0x166   : > { %810 = vadd.xlane.f32.xlu0 %v809_v32  ;;  %v821_v46 = vsel %vm454_vm0, %v795_v31, 0.0  ;;  %v797_v47 = vmul.f32 %v2086_v54, %v774_v36  ;;  %v764_v48 = vadd.f32 %v738_v39, %v2073_v28  ;;  %v763_v52 = vadd.f32 %v738_v39, %v2069_v22 }
 0x167   : > { %v830_v50 = vsel %vm454_vm0, %v798_v42, 0.0  ;;  %v796_v51 = vmul.f32 %v2086_v54, %v773_v43  ;;  %v742_v53 = vrot.slane %v710_v40, %v2078_v38  ;;  %v760_v55 = vadd.f32 %v730_v57, %v548_v49 }
 0x168   : > { %816 = vadd.xlane.f32.xlu1 %v815_v37  ;;  %v827_v56 = vsel %vm454_vm0, %v797_v47, 0.0  ;;  %v801_v58 = vmul.f32 %v2086_v54, %v778_v45  ;;  %v780_v59 = vmax.f32 %v764_v48, 0.0  ;;  %v800_v60 = vmul.f32 %v2086_v54, %v777_v44 }
 0x169   : > { %v824_v28 = vsel %vm454_vm0, %v796_v51, 0.0  ;;  %v779_v61 = vmax.f32 %v763_v52, 0.0  ;;  %v765_v62 = vadd.f32 %v2067_v20, %v742_v53  ;;  %v776_v63 = vmax.f32 %v760_v55, 0.0 }
 0x16a   : > { %819 = vadd.xlane.f32.xlu0 %v818_v41  ;;  %v839_v22 = vsel %vm454_vm0, %v801_v58, 0.0  ;;  %v803_v38 = vmul.f32 %v2086_v54, %v780_v59  ;;  %v766_v57 = vadd.f32 %v2071_v26, %v742_v53  ;;  %v836_v0 = vsel %vm454_vm0, %v800_v60, 0.0 }
 0x16b   : > { %v802_v1 = vmul.f32 %v2086_v54, %v779_v61  ;;  %v781_v7 = vmax.f32 %v765_v62, 0.0  ;;  %v799_v9 = vmul.f32 %v2086_v54, %v776_v63 }
 0x16c   : > { %822 = vadd.xlane.f32.xlu1 %v821_v46  ;;  %v845_v8 = vsel %vm454_vm0, %v803_v38, 0.0  ;;  %v782_v20 = vmax.f32 %v766_v57, 0.0 }
 0x16d   : > { %v842_v11 = vsel %vm454_vm0, %v802_v1, 0.0  ;;  %v804_v13 = vmul.f32 %v2086_v54, %v781_v7  ;;  %v833_v26 = vsel %vm454_vm0, %v799_v9, 0.0 }
 0x16e   : > { %831 = vadd.xlane.f32.xlu0 %v830_v50  ;;  %v805_v14 = vmul.f32 %v2086_v54, %v782_v20 }
 0x16f   : > { %v848_v16 = vsel %vm454_vm0, %v804_v13, 0.0 }
 0x170   : > { %828 = vadd.xlane.f32.xlu1 %v827_v56  ;;  %v851_v17 = vsel %vm454_vm0, %v805_v14, 0.0 }
 0x172   : > { %825 = vadd.xlane.f32.xlu0 %v824_v28 }
 0x174   : > { %840 = vadd.xlane.f32.xlu1 %v839_v22 }
 0x176   : > { %837 = vadd.xlane.f32.xlu0 %v836_v0 }
 0x178   : > { %846 = vadd.xlane.f32.xlu1 %v845_v8 }
 0x17a   : > { %843 = vadd.xlane.f32.xlu0 %v842_v11 }
 0x17c   : > { %834 = vadd.xlane.f32.xlu1 %v833_v26 }
 0x17e   : > { %849 = vadd.xlane.f32.xlu0 %v848_v16 }
 0x180   : > { %852 = vadd.xlane.f32.xlu1 %v851_v17 }
 0x1eb   : > { %v808_v18 = vpop.xlane.xlu0 %807 }
 0x1ed   : > { %v814_v19 = vpop.xlane.xlu1 %813 }
 0x1ef   : > { %v811_v21 = vpop.xlane.xlu0 %810 }
 0x1f0   : > { %v854_v23 = vmax.f32 %v808_v18, %v811_v21 }
 0x1f1   : > { %v817_v27 = vpop.xlane.xlu1 %816 }
 0x1f2   : > { %v855_v24 = vrot.slane %v854_v23, 4  ;;  %v861_v29 = vmax.f32 %v814_v19, %v817_v27 }
 0x1f3   : > { %v820_v30 = vpop.xlane.xlu0 %819 }
 0x1f4   : > { %v856_v32 = vmax.f32 %v854_v23, %v855_v24  ;;  %v862_v25 = vrot.slane %v861_v29, 4 }
 0x1f5   : > { %v823_v34 = vpop.xlane.xlu1 %822 }
 0x1f6   : > { %v857_v33 = vrot.slane %v856_v32, 2  ;;  %v863_v54 = vmax.f32 %v861_v29, %v862_v25  ;;  %v868_v35 = vmax.f32 %v820_v30, %v823_v34 }
 0x1f7   : > { %v2129_v36 = vpop.xlane.xlu0 %831 }
 0x1f8   : > { %v858_v37 = vmax.f32 %v856_v32, %v857_v33  ;;  %v864_v31 = vrot.slane %v863_v54, 2  ;;  %v869_v39 = vrot.slane %v868_v35, 4 }
 0x1f9   : > { %v829_v41 = vpop.xlane.xlu1 %828 }
 0x1fa   : > { %v859_v40 = vrot.slane %v858_v37, 1  ;;  %v865_v42 = vmax.f32 %v863_v54, %v864_v31  ;;  %v870_v43 = vmax.f32 %v868_v35, %v869_v39 }
 0x1fb   : > { %v826_v44 = vpop.xlane.xlu0 %825 }
 0x1fc   : > { %v860_v45 = vmax.f32 %v858_v37, %v859_v40  ;;  %v875_v46 = vmax.f32 %v826_v44, %v829_v41  ;;  %v866_v47 = vrot.slane %v865_v42, 1  ;;  %v871_v48 = vrot.slane %v870_v43, 2 }
 0x1fd   : > { %v2131_v52 = vpop.xlane.xlu1 %840 }
 0x1fe   : > { %v910_v49 = vsub.f32 %v808_v18, %v860_v45  ;;  %v911_v50 = vsub.f32 %v811_v21, %v860_v45  ;;  %v876_v51 = vrot.slane %v875_v46, 4  ;;  %v867_v53 = vmax.f32 %v865_v42, %v866_v47 }
 0x1ff   : > { %v872_v55 = vmax.f32 %v870_v43, %v871_v48  ;;  %v838_v56 = vpop.xlane.xlu0 %837 }
 0x200   : > { %v926_v58 = vmul.f32 1.442695, %v910_v49  ;;  %v928_v59 = vmul.f32 1.442695, %v911_v50  ;;  %v877_v28 = vmax.f32 %v875_v46, %v876_v51  ;;  %v889_v60 = vmax.f32 %v838_v56, %v2131_v52 }
 0x201   : > { %v912_v61 = vsub.f32 %v814_v19, %v867_v53  ;;  %v913_v62 = vsub.f32 %v817_v27, %v867_v53  ;;  %v873_v63 = vrot.slane %v872_v55, 1  ;;  %v2134_v57 = vpop.xlane.xlu1 %846 }
 0x202   : > { %1540 = vpow2.f32 %v926_v58  ;;  %v878_v22 = vrot.slane %v877_v28, 2  ;;  %v890_v38 = vrot.slane %v889_v60, 4 }
 0x203   : > { %1542 = vpow2.f32 %v928_v59  ;;  %v930_v0 = vmul.f32 1.442695, %v912_v61  ;;  %v932_v1 = vmul.f32 1.442695, %v913_v62  ;;  %v874_v7 = vmax.f32 %v872_v55, %v873_v63  ;;  %v844_v8 = vpop.xlane.xlu0 %843 }
 0x204   : > { %v879_v9 = vmax.f32 %v877_v28, %v878_v22  ;;  %v891_v20 = vmax.f32 %v889_v60, %v890_v38  ;;  %v896_v11 = vmax.f32 %v844_v8, %v2134_v57 }
 0x205   : > { %1544 = vpow2.f32 %v930_v0  ;;  %v914_v13 = vsub.f32 %v820_v30, %v874_v7  ;;  %v915_v26 = vsub.f32 %v823_v34, %v874_v7  ;;  %v2137_v18 = vpop.xlane.xlu1 %834 }
 0x206   : > { %1546 = vpow2.f32 %v932_v1  ;;  %v880_v14 = vrot.slane %v879_v9, 1  ;;  %v892_v16 = vrot.slane %v891_v20, 2  ;;  %v897_v17 = vrot.slane %v896_v11, 4 }
 0x207   : > { %v934_v19 = vmul.f32 1.442695, %v914_v13  ;;  %v936_v21 = vmul.f32 1.442695, %v915_v26  ;;  %v882_v23 = vmax.f32 %v2129_v36, %v2137_v18  ;;  %v2141_v34 = vpop.xlane.xlu0 %849 }
 0x208   : > { %v881_v24 = vmax.f32 %v879_v9, %v880_v14  ;;  %v893_v27 = vmax.f32 %v891_v20, %v892_v16  ;;  %v898_v29 = vmax.f32 %v896_v11, %v897_v17 }
 0x209   : > { %1548 = vpow2.f32 %v934_v19  ;;  %v883_v32 = vrot.slane %v882_v23, 4  ;;  %v2143_v54 = vpop.xlane.xlu1 %852 }
 0x20a   : > { %1550 = vpow2.f32 %v936_v21  ;;  %v916_v25 = vsub.f32 %v826_v44, %v881_v24  ;;  %v917_v30 = vsub.f32 %v829_v41, %v881_v24  ;;  %v894_v33 = vrot.slane %v893_v27, 1 }
 0x20b   : > { %v899_v35 = vrot.slane %v898_v29, 2  ;;  %v884_v37 = vmax.f32 %v882_v23, %v883_v32  ;;  %v903_v31 = vmax.f32 %v2141_v34, %v2143_v54 }
 0x20c   : > { %v938_v39 = vmul.f32 1.442695, %v916_v25  ;;  %v940_v40 = vmul.f32 1.442695, %v917_v30  ;;  %v895_v42 = vmax.f32 %v893_v27, %v894_v33 }
 0x20d   : > { %v900_v43 = vmax.f32 %v898_v29, %v899_v35  ;;  %v885_v45 = vrot.slane %v884_v37, 2  ;;  %v904_v46 = vrot.slane %v903_v31, 4 }
 0x20e   : > { %1552 = vpow2.f32 %v938_v39  ;;  %v920_v47 = vsub.f32 %v838_v56, %v895_v42  ;;  %v921_v41 = vsub.f32 %v2131_v52, %v895_v42 }
 0x20f   : > { %v2148_v44 = vpop.eup %1540  ;;  %1554 = vpow2.f32 %v940_v40  ;;  %v901_v48 = vrot.slane %v900_v43, 1  ;;  %v886_v49 = vmax.f32 %v884_v37, %v885_v45  ;;  %v905_v50 = vmax.f32 %v903_v31, %v904_v46 }
 0x210   : > { %v2150_v51 = vpop.eup %1542  ;;  %v946_v53 = vmul.f32 1.442695, %v920_v47  ;;  %v948_v55 = vmul.f32 1.442695, %v921_v41 }
 0x211   : > { %v958_v58 = vadd.f32 %v2150_v51, %v2148_v44  ;;  %v902_v59 = vmax.f32 %v900_v43, %v901_v48  ;;  %v887_v28 = vrot.slane %v886_v49, 1  ;;  %v906_v60 = vrot.slane %v905_v50, 2 }
 0x212   : > { %v2154_v61 = vpop.eup %1544  ;;  %1556 = vpow2.f32 %v946_v53 }
 0x213   : > { %v2156_v52 = vpop.eup %1546  ;;  %v959_v56 = vrot.slane %v958_v58, 4  ;;  %1558 = vpow2.f32 %v948_v55  ;;  %v922_v62 = vsub.f32 %v844_v8, %v902_v59  ;;  %v923_v63 = vsub.f32 %v2134_v57, %v902_v59 }
 0x214   : > { %v965_v22 = vadd.f32 %v2156_v52, %v2154_v61  ;;  %v888_v38 = vmax.f32 %v886_v49, %v887_v28  ;;  %v907_v0 = vmax.f32 %v905_v50, %v906_v60 }
 0x215   : > { %v960_v1 = vadd.f32 %v959_v56, %v958_v58  ;;  %v950_v7 = vmul.f32 1.442695, %v922_v62  ;;  %v952_v9 = vmul.f32 1.442695, %v923_v63 }
 0x216   : > { %v2161_v20 = vpop.eup %1548  ;;  %v966_v11 = vrot.slane %v965_v22, 4  ;;  %v918_v13 = vsub.f32 %v2129_v36, %v888_v38  ;;  %v919_v26 = vsub.f32 %v2137_v18, %v888_v38  ;;  %v908_v14 = vrot.slane %v907_v0, 1 }
 0x217   : > { %v2165_v16 = vpop.eup %1550  ;;  %v961_v8 = vrot.slane %v960_v1, 2  ;;  %1560 = vpow2.f32 %v950_v7 }
 0x218   : > { %v967_v57 = vadd.f32 %v966_v11, %v965_v22  ;;  %v972_v17 = vadd.f32 %v2165_v16, %v2161_v20  ;;  %1562 = vpow2.f32 %v952_v9  ;;  %v942_v19 = vmul.f32 1.442695, %v918_v13 }
 0x219   : > { %v962_v21 = vadd.f32 %v961_v8, %v960_v1  ;;  %v944_v23 = vmul.f32 1.442695, %v919_v26  ;;  %v909_v24 = vmax.f32 %v907_v0, %v908_v14  ;;  %v1038_v11 = vunpack.c.l.bf16 %v2026_v2 }
 0x21a   : > { %v968_v27 = vrot.slane %v967_v57, 2  ;;  %v973_v29 = vrot.slane %v972_v17, 4  ;;  %1564 = vpow2.f32 %v942_v19  ;;  %v1039_v26 = vunpack.c.h.bf16 %v2026_v2 }
 0x21b   : > { %v2169_v36 = vpop.eup %1552  ;;  %v963_v18 = vrot.slane %v962_v21, 1  ;;  %1566 = vpow2.f32 %v944_v23  ;;  %v924_v32 = vsub.f32 %v2141_v34, %v909_v24  ;;  %v925_v25 = vsub.f32 %v2143_v54, %v909_v24 }
 0x21c   : > { %v2173_v30 = vpop.eup %1554  ;;  %v969_v33 = vadd.f32 %v968_v27, %v967_v57  ;;  %v974_v35 = vadd.f32 %v973_v29, %v972_v17  ;;  %v1040_v29 = vunpack.c.l.bf16 %v2032_v4 }
 0x21d   : > { %v964_v37 = vadd.f32 %v963_v18, %v962_v21  ;;  %v979_v31 = vadd.f32 %v2173_v30, %v2169_v36  ;;  %v954_v39 = vmul.f32 1.442695, %v924_v32  ;;  %v956_v40 = vmul.f32 1.442695, %v925_v25 }
 0x21e   : > { %v970_v42 = vrot.slane %v969_v33, 1  ;;  %v975_v43 = vrot.slane %v974_v35, 2  ;;  %v1041_v18 = vunpack.c.h.bf16 %v2032_v4 }
 0x21f   : > { %v2178_v45 = vpop.eup %1556  ;;  %1568 = vrcp.f32 %v964_v37  ;;  %v980_v46 = vrot.slane %v979_v31, 4 }
 0x220   : > { %v2180_v34 = vpop.eup %1558  ;;  %v971_v54 = vadd.f32 %v970_v42, %v969_v33  ;;  %v976_v47 = vadd.f32 %v975_v43, %v974_v35  ;;  %1570 = vpow2.f32 %v954_v39  ;;  %v1042_v39 = vunpack.c.l.bf16 %v2038_v6 }
 0x221   : > { %v981_v41 = vadd.f32 %v980_v46, %v979_v31  ;;  %v993_v48 = vadd.f32 %v2180_v34, %v2178_v45  ;;  %1572 = vpow2.f32 %v956_v40 }
 0x222   : > { %1574 = vrcp.f32 %v971_v54  ;;  %v977_v49 = vrot.slane %v976_v47, 1 }
 0x223   : > { %v982_v50 = vrot.slane %v981_v41, 2  ;;  %v994_v53 = vrot.slane %v993_v48, 4 }
 0x224   : > { %v2184_v55 = vpop.eup %1560  ;;  %v978_v58 = vadd.f32 %v977_v49, %v976_v47 }
 0x225   : > { %v2186_v59 = vpop.eup %1562  ;;  %v983_v28 = vadd.f32 %v982_v50, %v981_v41  ;;  %v995_v60 = vadd.f32 %v994_v53, %v993_v48  ;;  %v1043_v41 = vunpack.c.h.bf16 %v2038_v6 }
 0x226   : > { %1576 = vrcp.f32 %v978_v58  ;;  %v1000_v56 = vadd.f32 %v2186_v59, %v2184_v55 }
 0x227   : > { %v2190_v62 = vpop.eup %1564  ;;  %v984_v63 = vrot.slane %v983_v28, 1  ;;  %v996_v22 = vrot.slane %v995_v60, 2 }
 0x228   : > { %v2192_v38 = vpop.eup %1566  ;;  %v1001_v0 = vrot.slane %v1000_v56, 4 }
 0x229   : > { %v985_v1 = vadd.f32 %v984_v63, %v983_v28  ;;  %v997_v7 = vadd.f32 %v996_v22, %v995_v60  ;;  %v986_v9 = vadd.f32 %v2192_v38, %v2190_v62  ;;  %v1044_v22 = vunpack.c.l.bf16 %v2051_v10 }
 0x22a   : > { %v1002_v13 = vadd.f32 %v1001_v0, %v1000_v56 }
 0x22b   : > { %1578 = vrcp.f32 %v985_v1  ;;  %v998_v14 = vrot.slane %v997_v7, 1  ;;  %v987_v8 = vrot.slane %v986_v9, 4 }
 0x22c   : > { %v1569_v57 = vpop.eup %1568  ;;  %v1003_v17 = vrot.slane %v1002_v13, 2 }
 0x22d   : > { %v2203_v19 = vpop.eup %1570  ;;  %v1022_v21 = vmul.f32 %v1569_v57, %v2148_v44  ;;  %v1023_v23 = vmul.f32 %v1569_v57, %v2150_v51  ;;  %v999_v2 = vadd.f32 %v998_v14, %v997_v7  ;;  %v988_v24 = vadd.f32 %v987_v8, %v986_v9 }
 0x22e   : > { %v2207_v27 = vpop.eup %1572  ;;  %v1004_v32 = vadd.f32 %v1003_v17, %v1002_v13  ;;  %v1045_v7 = vunpack.c.h.bf16 %v2051_v10 }
 0x22f   : > { %v1575_v25 = vpop.eup %1574  ;;  %v1054_v33 = vmul.f32 %v1038_v11, %v1022_v21  ;;  %v1055_v35 = vmul.f32 %v1039_v26, %v1023_v23  ;;  %1167 = vst.msk [vmem:[%s2201_s3] sm:$0xff] %vm1166_vm2, %v1022_v21  ;;  %1168 = vst.msk [vmem:[%s2201_s3 + $0x8] sm:$0xff] %vm1166_vm2, %v1023_v23  ;;  %1580 = vrcp.f32 %v999_v2  ;;  %v989_v44 = vrot.slane %v988_v24, 2 }
 0x230   : > { %v1024_v51 = vmul.f32 %v1575_v25, %v2154_v61  ;;  %v1025_v37 = vmul.f32 %v1575_v25, %v2156_v52  ;;  %v1005_v31 = vrot.slane %v1004_v32, 1  ;;  %v1007_v4 = vadd.f32 %v2207_v27, %v2203_v19 }
 0x231   : > { %v1070_v40 = vsel %vm454_vm0, %v1054_v33, 0.0  ;;  %v1071_v42 = vsel %vm454_vm0, %v1055_v35, 0.0  ;;  %v990_v43 = vadd.f32 %v989_v44, %v988_v24  ;;  %v1048_v2 = vunpack.c.l.bf16 %v2063_v15 }
 0x232   : > { %v1072_v46 = vadd.f32 %v1071_v42, %v1070_v40  ;;  %v1056_v54 = vmul.f32 %v1040_v29, %v1024_v51  ;;  %v1057_v47 = vmul.f32 %v1041_v18, %v1025_v37  ;;  %1169 = vst.msk [vmem:[%s2201_s3 + $0x10] sm:$0xff] %vm1166_vm2, %v1024_v51  ;;  %1170 = vst.msk [vmem:[%s2201_s3 + $0x18] sm:$0xff] %vm1166_vm2, %v1025_v37  ;;  %v1008_v49 = vrot.slane %v1007_v4, 4 }
 0x233   : > { %v1006_v61 = vadd.f32 %v1005_v31, %v1004_v32  ;;  %v1577_v52 = vpop.eup %1576  ;;  %v991_v48 = vrot.slane %v990_v43, 1  ;;  %v1049_v25 = vunpack.c.h.bf16 %v2063_v15  ;;  %v1050_v42 = vunpack.c.l.bf16 %v2029_v3 }
 0x234   : > { %v1073_v50 = vrot.slane %v1072_v46, 4  ;;  %v1079_v53 = vsel %vm454_vm0, %v1056_v54, 0.0  ;;  %v1080_v58 = vsel %vm454_vm0, %v1057_v47, 0.0  ;;  %v1026_v28 = vmul.f32 %v1577_v52, %v2161_v20 }
 0x235   : > { %v1081_v60 = vadd.f32 %v1080_v58, %v1079_v53  ;;  %v1027_v56 = vmul.f32 %v1577_v52, %v2165_v16  ;;  %1582 = vrcp.f32 %v1006_v61  ;;  %v992_v63 = vadd.f32 %v991_v48, %v990_v43 }
 0x236   : > { %v1074_v0 = vadd.f32 %v1073_v50, %v1072_v46  ;;  %v1058_v1 = vmul.f32 %v1042_v39, %v1026_v28  ;;  %1171 = vst.msk [vmem:[%s2201_s3 + $0x20] sm:$0xff] %vm1166_vm2, %v1026_v28  ;;  %v1009_v6 = vadd.f32 %v1008_v49, %v1007_v4  ;;  %v1046_v48 = vunpack.c.l.bf16 %v2054_v12 }
 0x237   : > { %v1082_v9 = vrot.slane %v1081_v60, 4  ;;  %v1059_v11 = vmul.f32 %v1043_v41, %v1027_v56  ;;  %1172 = vst.msk [vmem:[%s2201_s3 + $0x28] sm:$0xff] %vm1166_vm2, %v1027_v56  ;;  %1584 = vrcp.f32 %v992_v63  ;;  %v1047_v63 = vunpack.c.h.bf16 %v2054_v12 }
 0x238   : > { %v1579_v20 = vpop.eup %1578  ;;  %v1075_v16 = vrot.slane %v1074_v0, 2  ;;  %v1088_v13 = vsel %vm454_vm0, %v1058_v1, 0.0  ;;  %v1010_v26 = vrot.slane %v1009_v6, 2 }
 0x239   : > { %v1083_v14 = vadd.f32 %v1082_v9, %v1081_v60  ;;  %v1089_v8 = vsel %vm454_vm0, %v1059_v11, 0.0  ;;  %v1028_v57 = vmul.f32 %v1579_v20, %v2169_v36  ;;  %v1029_v17 = vmul.f32 %v1579_v20, %v2173_v30 }
 0x23a   : > { %v1076_v10 = vadd.f32 %v1075_v16, %v1074_v0  ;;  %v1090_v21 = vadd.f32 %v1089_v8, %v1088_v13  ;;  %v1011_v23 = vadd.f32 %v1010_v26, %v1009_v6 }
 0x23b   : > { %v1084_v24 = vrot.slane %v1083_v14, 2  ;;  %v1060_v29 = vmul.f32 %v1044_v22, %v1028_v57  ;;  %v1061_v18 = vmul.f32 %v1045_v7, %v1029_v17  ;;  %1173 = vst.msk [vmem:[%s2201_s3 + $0x30] sm:$0xff] %vm1166_vm2, %v1028_v57  ;;  %1174 = vst.msk [vmem:[%s2201_s3 + $0x38] sm:$0xff] %vm1166_vm2, %v1029_v17 }
 0x23c   : > { %v1581_v32 = vpop.eup %1580  ;;  %v1077_v33 = vrot.slane %v1076_v10, 1  ;;  %v1091_v36 = vrot.slane %v1090_v21, 4  ;;  %v1012_v35 = vrot.slane %v1011_v23, 1 }
 0x23d   : > { %v1085_v30 = vadd.f32 %v1084_v24, %v1083_v14  ;;  %v1097_v44 = vsel %vm454_vm0, %v1060_v29, 0.0  ;;  %v1098_v51 = vsel %vm454_vm0, %v1061_v18, 0.0  ;;  %v1032_v37 = vmul.f32 %v1581_v32, %v2178_v45 }
 0x23e   : > { %v1092_v31 = vadd.f32 %v1091_v36, %v1090_v21  ;;  %v1099_v4 = vadd.f32 %v1098_v51, %v1097_v44  ;;  %v1033_v39 = vmul.f32 %v1581_v32, %v2180_v34  ;;  %v1013_v40 = vadd.f32 %v1012_v35, %v1011_v23 }
 0x23f   : > { %v1086_v43 = vrot.slane %v1085_v30, 1  ;;  %v1064_v15 = vmul.f32 %v1048_v2, %v1032_v37  ;;  %1177 = vst.msk [vmem:[%s2201_s3 + $0x50] sm:$0xff] %vm1166_vm2, %v1032_v37  ;;  %v1051_v45 = vunpack.c.h.bf16 %v2029_v3  ;;  %v1078_v52 = vadd.f32 %v1077_v33, %v1076_v10 }
 0x240   : > { %v1093_v46 = vrot.slane %v1092_v31, 2  ;;  %v1100_v54 = vrot.slane %v1099_v4, 4  ;;  %v1065_v47 = vmul.f32 %v1049_v25, %v1033_v39  ;;  %1178 = vst.msk [vmem:[%s2201_s3 + $0x58] sm:$0xff] %vm1166_vm2, %v1033_v39  ;;  %1586 = vrcp.f32 %v1013_v40 }
 0x241   : > { %v1115_v61 = vsel %vm454_vm0, %v1064_v15, 0.0  ;;  %v1087_v34 = vadd.f32 %v1086_v43, %v1085_v30  ;;  %v1052_v21 = vunpack.c.l.bf16 %v2035_v5  ;;  %v1053_v2 = vunpack.c.h.bf16 %v2035_v5 }
 0x242   : > { %v1583_v41 = vpop.eup %1582  ;;  %v1094_v49 = vadd.f32 %v1093_v46, %v1092_v31  ;;  %v1101_v50 = vadd.f32 %v1100_v54, %v1099_v4  ;;  %v1116_v53 = vsel %vm454_vm0, %v1065_v47, 0.0 }
 0x243   : > { %v1117_v58 = vadd.f32 %v1116_v53, %v1115_v61  ;;  %v1034_v28 = vmul.f32 %v1583_v41, %v2184_v55  ;;  %v1035_v60 = vmul.f32 %v1583_v41, %v2186_v59  ;;  %v1151_v3 = vsel %vm1150_vm3, %v1087_v34, %v1078_v52 }
 0x244   : > { %v1585_v56 = vpop.eup %1584  ;;  %v1102_v22 = vrot.slane %v1101_v50, 2  ;;  %v1095_v0 = vrot.slane %v1094_v49, 1 }
 0x245   : > { %v1118_v1 = vrot.slane %v1117_v58, 4  ;;  %v1066_v6 = vmul.f32 %v1050_v42, %v1034_v28  ;;  %v1067_v7 = vmul.f32 %v1051_v45, %v1035_v60  ;;  %1179 = vst.msk [vmem:[%s2201_s3 + $0x60] sm:$0xff] %vm1166_vm2, %v1034_v28  ;;  %1180 = vst.msk [vmem:[%s2201_s3 + $0x68] sm:$0xff] %vm1166_vm2, %v1035_v60  ;;  %v1030_v55 = vmul.f32 %v1585_v56, %v2190_v62 }
 0x246   : > { %v1031_v59 = vmul.f32 %v1585_v56, %v2192_v38  ;;  %v1096_v9 = vadd.f32 %v1095_v0, %v1094_v49  ;;  %v1103_v11 = vadd.f32 %v1102_v22, %v1101_v50 }
 0x247   : > { %v1124_v12 = vsel %vm454_vm0, %v1066_v6, 0.0  ;;  %v1125_v20 = vsel %vm454_vm0, %v1067_v7, 0.0  ;;  %v1062_v16 = vmul.f32 %v1046_v48, %v1030_v55  ;;  %1175 = vst.msk [vmem:[%s2201_s3 + $0x40] sm:$0xff] %vm1166_vm2, %v1030_v55  ;;  %v1119_v13 = vadd.f32 %v1118_v1, %v1117_v58 }
 0x248   : > { %v1126_v26 = vadd.f32 %v1125_v20, %v1124_v12  ;;  %v1063_v14 = vmul.f32 %v1047_v63, %v1031_v59  ;;  %1176 = vst.msk [vmem:[%s2201_s3 + $0x48] sm:$0xff] %vm1166_vm2, %v1031_v59  ;;  %v1104_v8 = vrot.slane %v1103_v11, 1  ;;  %v1153_v57 = vsel %vm1152_vm4, %v1096_v9, %v1151_v3 }
 0x249   : > { %v1106_v62 = vsel %vm454_vm0, %v1062_v16, 0.0  ;;  %v1120_v24 = vrot.slane %v1119_v13, 2 }
 0x24a   : > { %v1107_v38 = vsel %vm454_vm0, %v1063_v14, 0.0  ;;  %v1105_v17 = vadd.f32 %v1104_v8, %v1103_v11  ;;  %v1127_v10 = vrot.slane %v1126_v26, 4 }
 0x24b   : > { %v1108_v23 = vadd.f32 %v1107_v38, %v1106_v62  ;;  %v1121_v37 = vadd.f32 %v1120_v24, %v1119_v13 }
 0x24c   : > { %v1128_v29 = vadd.f32 %v1127_v10, %v1126_v26  ;;  %v1155_v18 = vsel %vm1154_vm5, %v1105_v17, %v1153_v57 }
 0x24d   : > { %v1587_v32 = vpop.eup %1586  ;;  %v1109_v25 = vrot.slane %v1108_v23, 4 }
 0x24e   : > { %v1036_v33 = vmul.f32 %v1587_v32, %v2203_v19  ;;  %v1037_v36 = vmul.f32 %v1587_v32, %v2207_v27  ;;  %v1129_v35 = vrot.slane %v1128_v29, 2  ;;  %v1122_v19 = vrot.slane %v1121_v37, 1 }
 0x24f   : > { %v1110_v30 = vadd.f32 %v1109_v25, %v1108_v23 }
 0x250   : > { %v1068_v44 = vmul.f32 %v1052_v21, %v1036_v33  ;;  %v1069_v51 = vmul.f32 %v1053_v2, %v1037_v36  ;;  %1181 = vst.msk [vmem:[%s2201_s3 + $0x70] sm:$0xff] %vm1166_vm2, %v1036_v33  ;;  %1182 = vst.msk [vmem:[%s2201_s3 + $0x78] sm:$0xff] %vm1166_vm2, %v1037_v36  ;;  %v1130_v5 = vadd.f32 %v1129_v35, %v1128_v29 }
 0x251   : > { %v1111_v31 = vrot.slane %v1110_v30, 2  ;;  %v1123_v47 = vadd.f32 %v1122_v19, %v1121_v37 }
 0x252   : > { %v1134_v4 = vsel %vm454_vm0, %v1069_v51, 0.0  ;;  %v1133_v39 = vsel %vm454_vm0, %v1068_v44, 0.0  ;;  %v1131_v27 = vrot.slane %v1130_v5, 1 }
 0x253   : > { %v1112_v40 = vadd.f32 %v1111_v31, %v1110_v30  ;;  %v1135_v42 = vadd.f32 %v1134_v4, %v1133_v39 }
 0x254   : > { %v1132_v45 = vadd.f32 %v1131_v27, %v1130_v5 }
 0x255   : > { %v1113_v43 = vrot.slane %v1112_v40, 1  ;;  %v1136_v15 = vrot.slane %v1135_v42, 4 }
 0x257   : > { %v1114_v46 = vadd.f32 %v1113_v43, %v1112_v40  ;;  %v1137_v54 = vadd.f32 %v1136_v15, %v1135_v42 }
 0x259   : > { %v1138_v61 = vrot.slane %v1137_v54, 2  ;;  %v1157_v52 = vsel %vm1156_vm6, %v1114_v46, %v1155_v18 }
 0x25a   : > { %v1159_v34 = vsel %vm1158_vm7, %v1123_v47, %v1157_v52 }
 0x25b   : > { %v1139_v41 = vadd.f32 %v1138_v61, %v1137_v54  ;;  %v1161_v48 = vsel %vm1160_vm8, %v1132_v45, %v1159_v34 }
 0x25d   : > { %v1140_v49 = vrot.slane %v1139_v41, 1 }
 0x25f   : > { %v1141_v50 = vadd.f32 %v1140_v49, %v1139_v41 }
 0x261   : > { %v1163_v53 = vsel %vm1162_vm9, %v1141_v50, %v1161_v48 }
 0x262   : > { %1165 = vst.msk [vmem:[%s364_s23] sm:$0xff] %vm454_vm0, %v1163_v53 }
 0x263   : > { %1709 = shalt.err (!%p1706_p6)
}
 0x264   : > { %s1710_s13 = scalar_lea.hbm %s2295_s0, 128  ;;  %s1714_s22 = scalar_lea.hbm %s2338_s6, 512 }
 0x265   : > { %p1711_p7 = scmp.ne.s32.totalorder %s2295_s0, %s1710_s13  ;;  %p1715_p0 = scmp.lt.s32.totalorder %s2295_s0, %s2338_s6 }
 0x266   : > { %p1716_p11 = scmp.lt.s32.totalorder %s1714_s22, %s1710_s13 }
 0x267   : > { %p1712_p8 = pnand %p1711_p7, %p2371_p5 }
 0x268   : > { %p1717_p13 = por %p1716_p11, %p1715_p0 }
 0x269   : > { %p1713_p2 = pneg %p1712_p8 }
 0x26b   : > { %p1718_p3 = pnand %p1717_p13, %p1713_p2 }
 0x26d   : > { %1721 = shalt.err (!%p1718_p3)
}
 0x26e   : > { %1455 = dma.vmem_to_hbm [thread:$0]  (%p2371_p5), %s1204_s16, 128, %s2295_s0, %s1184_s15  }
 0x26f PF: > { %p1480_p10 = scmp.ge.s32.totalorder %s1772_s27, 2  ;;  %s1219_s12 = sand.u32 1, %s1760_s24  }
 0x270   : > { %p2372_p9 = scmp.ne.s32.totalorder %s2352_s8, 0  ;;  %s1220_s20 = scalar_lea.sflag [#allocation4], %s1219_s12 }
 0x272   : > { %p1472_p12 = pnand %p1480_p10, %p2372_p9 }
 0x274   : > { %p1473_p1 = pneg %p1472_p12 }
 0x276   : > { %1755 = dma.done.wait (%p1473_p1), %s1220_s20, 128  }
 0x277   : > { %1757 = vsyncadd (%p1473_p1), %s1220_s20, 4294967168  ;;  %s2373_s3 = sld [smem:[#allocation16_spill]]  ;;  %p25_p4 = scmp.ge.s32.totalorder %s1900_s10, 6  }
 0x278   : > { %s2374_s26 = sld [smem:[#allocation17_spill]]  ;;  %s2375_s24 = smov %s1764_s25 }
 0x279   : > { %s2377_s27 = smov %s1900_s10  ;;  %27 = sbr.rel (!%p25_p4) target bundleno = 12 (0xc), region = 122 }
 0x27d   : > { %s2376_s25 = smov %s2373_s3 }
 0x27e   :  { %1234 = vsyncpa [#allocation3], 1 }
 0x27f   :  { %1236 = vsyncpa [#allocation3 + $0x1], 1 }
 0x280   :  { %1237 = vsyncpa [#allocation6], 1 }
 0x281   :  { %1239 = vsyncpa [#allocation6 + $0x1], 1 }
 0x282   :  { %1240 = vsyncpa [#allocation9], 1 }
 0x283   :  { %1241 = vsyncpa [#allocation4], 1 }
 0x284   :  { %1243 = vsyncpa [#allocation4 + $0x1], 1 }

</bundles_post_ra>
